<compile_context>
chip_gen: v7x
topology: tpu7x:2x2x1
jax: 0.10.0
libtpu: 0.0.40
codegen_flags: <defaults>
</compile_context>

<pallas_src>
import functools

import jax
import jax.numpy as jnp
from jax.experimental import pallas as pl
from jax.experimental.pallas import tpu as pltpu


def _round_up(x, m):
    return (x + m - 1) // m * m


def _cdiv(a, b):
    return (a + b - 1) // b


def _fold_bn(gamma, beta, mean, var, eps=1e-5):
    scale = gamma / jnp.sqrt(var + eps)
    return scale, beta - mean * scale


def _dws_kernel(ph_ref, dw_ref, b1_ref, pw_ref, b2_ref, o_ref, *,
                stride, tile_h, w_tile):
    """Fused depthwise 3x3 + shift + ReLU + pointwise matmul + shift + ReLU.

    ph_ref : (s*s, 1, Hq, Wq, Cp)  space-to-depth phases of the padded input
                                   (compute_dtype).
    dw_ref : (9, 1, 1, Cp)   depthwise weights, BN1 scale folded (compute_dtype).
    b1_ref : (1, 1, Cp)      BN1 shift (compute_dtype).
    pw_ref : (Cp, Cop)       pointwise weights, BN2 scale folded (mxu_dtype).
    b2_ref : (1, Cop)        BN2 shift (f32).
    o_ref  : (1, tile_h, w_tile, Cop)
    """
    s = stride
    ho0 = pl.program_id(1) * tile_h

    dw = dw_ref[...]                      # loaded once; broadcasts hoisted
    acc = None
    for kh in range(3):
        for kw in range(3):
            # padded-input row s*ho + kh lives in phase (kh % s, kw % s)
            # at phase-row ho + kh // s, phase-col wo + kw // s.
            phase = (kh % s) * s + (kw % s)
            tap = ph_ref[phase, 0,
                         pl.ds(ho0 + kh // s, tile_h),
                         pl.ds(kw // s, w_tile), :]
            term = tap * dw[3 * kh + kw]
            acc = term if acc is None else acc + term

    # BN1 shift + ReLU (scale already folded into dw); stays in compute_dtype.
    h = jnp.maximum(acc + b1_ref[...], 0.0)

    # Pointwise 1x1 conv == channel matmul on the MXU.  w_tile is a multiple
    # of 8 and Cp a multiple of 128, so this reshape is a free (8,128)-aligned
    # view (M = tile_h * w_tile).
    hm = h.reshape(tile_h * w_tile, h.shape[-1]).astype(pw_ref.dtype)
    y = jnp.dot(hm, pw_ref[...], preferred_element_type=jnp.float32)

    # BN2 shift + ReLU, then full unmasked store.
    y = jnp.maximum(y + b2_ref[...], 0.0)
    o_ref[0] = y.reshape(tile_h, w_tile, y.shape[-1]).astype(o_ref.dtype)


def depthwise_separable(x_nchw, params, stride, *, tile_h=None,
                        compute_dtype=jnp.float32,
                        mxu_dtype=jnp.bfloat16,
                        out_dtype=None):
    """Forward pass of DepthWiseSeparable. Input/output are NCHW like PyTorch.

    compute_dtype : depthwise-stage dtype (use bfloat16 on v6e/v7x).
    mxu_dtype     : pointwise matmul dtype (bf16 is native MXU rate everywhere;
                    f32 accumulation is kept via preferred_element_type).
    out_dtype     : output dtype (default: x.dtype).
    """
    N, C_in, H, W = x_nchw.shape
    C_out = params["pw_w"].shape[0]
    H_out = (H + 2 - 3) // stride + 1
    W_out = (W + 2 - 3) // stride + 1
    out_dtype = x_nchw.dtype if out_dtype is None else out_dtype

    # Lane-dense channel padding.
    Cp = _round_up(C_in, 128)
    Cop = _round_up(C_out, 128)

    # Sublane-dense W padding of the *output*.
    W_pad = _round_up(W_out, 8)

    # Row tile: target MXU M dimension ~256; pad H_out up to a multiple of the
    # tile so we never fall back to tile_h == 1.
    if tile_h is None:
        tile_h = _cdiv(256, W_pad)
    th = max(1, min(tile_h, H_out))
    H_pad = _round_up(H_out, th)
    n_tiles = H_pad // th

    # Input (phase-domain) extents needed to cover all taps of all (possibly
    # padded) output positions.  max(kh//s) == max(kw//s) == 2 // stride.
    off = 2 // stride
    Hq = H_pad + off
    Wq = _round_up(W_pad + off, 8)
    Hp2, Wp2 = Hq * stride, Wq * stride       # padded-input extents

    # NCHW -> NHWC, conv pad=1 on top/left plus zero padding on bottom/right
    # up to (Hp2, Wp2); channel pad to Cp.  Padded rows/cols produce garbage
    # output rows/cols that are cropped below; valid outputs are unaffected.
    x = jnp.transpose(x_nchw, (0, 2, 3, 1)).astype(compute_dtype)
    xp = jnp.pad(x, ((0, 0), (1, Hp2 - H - 1), (1, Wp2 - W - 1),
                     (0, Cp - C_in)))

    # Space-to-depth phase split: pure relayout, exactly 1x the input data.
    if stride == 1:
        phases = xp[None]                                  # (1, N, Hq, Wq, Cp)
    else:
        phases = jnp.stack(
            [xp[:, pi::stride, pj::stride, :]
             for pi in range(stride) for pj in range(stride)],
            axis=0)                                        # (s*s, N, Hq, Wq, Cp)
    S2 = stride * stride

    # --- parameters: fold BN scales into the conv weights (trace-time). ---
    s1, b1 = _fold_bn(params["bn1_gamma"], params["bn1_beta"],
                      params["bn1_mean"], params["bn1_var"])
    s2, b2 = _fold_bn(params["bn2_gamma"], params["bn2_beta"],
                      params["bn2_mean"], params["bn2_var"])

    dw = params["dw_w"][:, 0, :, :]                        # (C_in, 3, 3)
    dw = jnp.transpose(dw, (1, 2, 0)).reshape(9, C_in) * s1[None, :]
    dw = jnp.pad(dw, ((0, 0), (0, Cp - C_in))).reshape(9, 1, 1, Cp)
    dw = dw.astype(compute_dtype)

    pw = jnp.transpose(params["pw_w"][:, :, 0, 0], (1, 0)) * s2[None, :]
    pw = jnp.pad(pw, ((0, Cp - C_in), (0, Cop - C_out))).astype(mxu_dtype)

    b1p = jnp.pad(b1, (0, Cp - C_in)).reshape(1, 1, Cp).astype(compute_dtype)
    b2p = jnp.pad(b2, (0, Cop - C_out)).reshape(1, Cop)    # stays f32

    # --- explicit VMEM budget (double-buffered resident blocks + out tile) ---
    cbytes = jnp.dtype(compute_dtype).itemsize
    need = (2 * S2 * Hq * Wq * Cp * cbytes                  # phase block
            + 2 * Cp * Cop * jnp.dtype(mxu_dtype).itemsize  # pointwise weights
            + 2 * th * W_pad * Cop * jnp.dtype(out_dtype).itemsize
            + 2 * (9 + 1) * Cp * cbytes + 2 * Cop * 4       # dw, b1, b2
            + (2 << 20))                                    # slack
    vmem_limit = int(min(max(need, 16 << 20), 64 << 20))    # valid on v7x too

    kernel = functools.partial(_dws_kernel, stride=stride, tile_h=th,
                               w_tile=W_pad)
    out = pl.pallas_call(
        kernel,
        out_shape=jax.ShapeDtypeStruct((N, H_pad, W_pad, Cop), out_dtype),
        grid=(N, n_tiles),
        in_specs=[
            # Whole (small) phase image per batch; constant along the tile
            # axis so it is DMAed once per image and stays resident.
            pl.BlockSpec((S2, 1, Hq, Wq, Cp), lambda n, t: (0, n, 0, 0, 0)),
            pl.BlockSpec((9, 1, 1, Cp), lambda n, t: (0, 0, 0, 0)),
            pl.BlockSpec((1, 1, Cp), lambda n, t: (0, 0, 0)),
            pl.BlockSpec((Cp, Cop), lambda n, t: (0, 0)),
            pl.BlockSpec((1, Cop), lambda n, t: (0, 0)),
        ],
        out_specs=pl.BlockSpec((1, th, W_pad, Cop), lambda n, t: (n, t, 0, 0)),
        compiler_params=pltpu.CompilerParams(
            dimension_semantics=("parallel", "parallel"),
            vmem_limit_bytes=vmem_limit),
    )(phases, dw, b1p, pw, b2p)

    # Crop spatial/channel padding, back to NCHW.
    return jnp.transpose(out[:, :H_out, :W_out, :C_out], (0, 3, 1, 2))


def _reference(x, params, stride, eps=1e-5):
    """Pure-JAX/XLA reference for correctness checking (eval-mode BN)."""
    y = jax.lax.conv_general_dilated(
        x, params["dw_w"], (stride, stride), ((1, 1), (1, 1)),
        feature_group_count=x.shape[1],
        dimension_numbers=("NCHW", "OIHW", "NCHW"))
    y = ((y - params["bn1_mean"][None, :, None, None])
         / jnp.sqrt(params["bn1_var"][None, :, None, None] + eps)
         * params["bn1_gamma"][None, :, None, None]
         + params["bn1_beta"][None, :, None, None])
    y = jnp.maximum(y, 0.0)
    y = jax.lax.conv_general_dilated(
        y, params["pw_w"], (1, 1), ((0, 0), (0, 0)),
        dimension_numbers=("NCHW", "OIHW", "NCHW"))
    y = ((y - params["bn2_mean"][None, :, None, None])
         / jnp.sqrt(params["bn2_var"][None, :, None, None] + eps)
         * params["bn2_gamma"][None, :, None, None]
         + params["bn2_beta"][None, :, None, None])
    return jnp.maximum(y, 0.0)


def _init_params(key, in_channels, out_channels):
    ks = jax.random.split(key, 8)
    return {
        "dw_w": 0.1 * jax.random.normal(ks[0], (in_channels, 1, 3, 3), jnp.float32),
        "pw_w": 0.1 * jax.random.normal(ks[1], (out_channels, in_channels, 1, 1), jnp.float32),
        "bn1_gamma": 1.0 + 0.1 * jax.random.normal(ks[2], (in_channels,), jnp.float32),
        "bn1_beta": 0.05 * jax.random.normal(ks[3], (in_channels,), jnp.float32),
        "bn1_mean": 0.02 * jax.random.normal(ks[4], (in_channels,), jnp.float32),
        "bn1_var": jnp.abs(0.5 + 0.1 * jax.random.normal(ks[5], (in_channels,), jnp.float32)),
        "bn2_gamma": 1.0 + 0.1 * jax.random.normal(ks[6], (out_channels,), jnp.float32),
        "bn2_beta": 0.05 * jax.random.normal(ks[7], (out_channels,), jnp.float32),
        "bn2_mean": jnp.zeros((out_channels,), jnp.float32),
        "bn2_var": jnp.ones((out_channels,), jnp.float32),
    }


if __name__ == "__main__":
    key = jax.random.PRNGKey(0)

    f32, bf16 = jnp.float32, jnp.bfloat16
    configs = [
        # (N, C_in, H, W, C_out, stride, tile_h, compute_dt, mxu_dt, out_dt, rtol, atol)
        (2, 4, 16, 16, 8, 2, None, f32,  f32,  None, 1e-4, 1e-4),  # stride-2
        (1, 8,  8,  8, 16, 1, None, f32,  f32,  None, 1e-4, 1e-4),  # stride-1
        (1, 4, 14, 14, 8, 1, 4,    f32,  f32,  None, 1e-4, 1e-4),  # W_out%8!=0, multi-tile H
        (1, 4, 14, 14, 8, 2, None, f32,  f32,  None, 1e-4, 1e-4),  # odd 7x7 output
        (2, 4, 16, 16, 8, 2, 3,    f32,  f32,  None, 1e-4, 1e-4),  # tile_h ∤ H_out
        (2, 4, 16, 16, 8, 2, None, bf16, bf16, bf16, 5e-2, 5e-2),  # bf16 path (v6e/v7x)
    ]

    for idx, (N, C_in, H, W, C_out, stride, th, cdt, mdt, odt,
              rtol, atol) in enumerate(configs):
        k_x, k_p = jax.random.split(jax.random.fold_in(key, idx))
        x = jax.random.normal(k_x, (N, C_in, H, W), jnp.float32)
        params = _init_params(k_p, C_in, C_out)

        out = jax.block_until_ready(
            depthwise_separable(x, params, stride, tile_h=th,
                                compute_dtype=cdt, mxu_dtype=mdt,
                                out_dtype=odt))
        ref = jax.block_until_ready(_reference(x, params, stride))

        assert out.shape == ref.shape, (idx, out.shape, ref.shape)
        err = float(jnp.max(jnp.abs(out.astype(jnp.float32) - ref)))
        assert jnp.allclose(out.astype(jnp.float32), ref,
                            rtol=rtol, atol=atol), (idx, err)

    print("KERNEL_OK")
</pallas_src>

<mosaic_0001>
module attributes {stable_mosaic.version = 11 : i64} {
  func.func @_dws_kernel(%arg0: i32, %arg1: i32, %arg2: memref<4x1x9x16x128xf32, #tpu.memory_space<vmem>>, %arg3: memref<9x1x1x128xf32, #tpu.memory_space<vmem>>, %arg4: memref<1x1x128xf32, #tpu.memory_space<vmem>>, %arg5: memref<128x128xf32, #tpu.memory_space<vmem>>, %arg6: memref<1x128xf32, #tpu.memory_space<vmem>>, %arg7: memref<1x8x8x128xf32, #tpu.memory_space<vmem>>) attributes {dimension_semantics = [#tpu.dimension_semantics<parallel>, #tpu.dimension_semantics<parallel>], iteration_bounds = array<i64: 2, 1>, scalar_prefetch = 0 : i64, scratch_operands = 0 : i64, tpu.core_type = #tpu.core_type<tc>, window_params = [{transform_indices = @transform_0, window_bounds = array<i64: 4, 1, 9, 16, 128>}, {pipeline_mode = #tpu.pipeline_mode<synchronous>, transform_indices = @transform_1, window_bounds = array<i64: 9, 1, 1, 128>}, {pipeline_mode = #tpu.pipeline_mode<synchronous>, transform_indices = @transform_2, window_bounds = array<i64: 1, 1, 128>}, {pipeline_mode = #tpu.pipeline_mode<synchronous>, transform_indices = @transform_3, window_bounds = array<i64: 128, 128>}, {pipeline_mode = #tpu.pipeline_mode<synchronous>, transform_indices = @transform_4, window_bounds = array<i64: 1, 128>}, {transform_indices = @transform_5, window_bounds = array<i64: 1, 8, 8, 128>}]} {
    %c8_i32 = arith.constant 8 : i32
    %0 = arith.muli %arg1, %c8_i32 : i32
    %c0 = arith.constant 0 : index
    %c0_0 = arith.constant 0 : index
    %c0_1 = arith.constant 0 : index
    %c0_2 = arith.constant 0 : index
    %1 = vector.load %arg3[%c0, %c0_0, %c0_1, %c0_2] : memref<9x1x1x128xf32, #tpu.memory_space<vmem>>, vector<9x1x1x128xf32>
    %c0_i32 = arith.constant 0 : i32
    %2 = arith.addi %0, %c0_i32 : i32
    %c0_3 = arith.constant 0 : index
    %c0_4 = arith.constant 0 : index
    %3 = arith.index_cast %2 : i32 to index
    %c0_5 = arith.constant 0 : index
    %c0_6 = arith.constant 0 : index
    %4 = vector.load %arg2[%c0_3, %c0_4, %3, %c0_5, %c0_6] : memref<4x1x9x16x128xf32, #tpu.memory_space<vmem>>, vector<1x1x8x8x128xf32>
    %5 = vector.shape_cast %4 : vector<1x1x8x8x128xf32> to vector<8x8x128xf32>
    %6 = vector.extract_strided_slice %1 {offsets = [0, 0, 0, 0], sizes = [1, 1, 1, 128], strides = [1, 1, 1, 1]} : vector<9x1x1x128xf32> to vector<1x1x1x128xf32>
    %7 = vector.shape_cast %6 : vector<1x1x1x128xf32> to vector<1x1x128xf32>
    %8 = vector.broadcast %7 : vector<1x1x128xf32> to vector<8x8x128xf32>
    %9 = arith.mulf %5, %8 : vector<8x8x128xf32>
    %c0_i32_7 = arith.constant 0 : i32
    %10 = arith.addi %0, %c0_i32_7 : i32
    %c1 = arith.constant 1 : index
    %c0_8 = arith.constant 0 : index
    %11 = arith.index_cast %10 : i32 to index
    %c0_9 = arith.constant 0 : index
    %c0_10 = arith.constant 0 : index
    %12 = vector.load %arg2[%c1, %c0_8, %11, %c0_9, %c0_10] : memref<4x1x9x16x128xf32, #tpu.memory_space<vmem>>, vector<1x1x8x8x128xf32>
    %13 = vector.shape_cast %12 : vector<1x1x8x8x128xf32> to vector<8x8x128xf32>
    %14 = vector.extract_strided_slice %1 {offsets = [1, 0, 0, 0], sizes = [1, 1, 1, 128], strides = [1, 1, 1, 1]} : vector<9x1x1x128xf32> to vector<1x1x1x128xf32>
    %15 = vector.shape_cast %14 : vector<1x1x1x128xf32> to vector<1x1x128xf32>
    %16 = vector.broadcast %15 : vector<1x1x128xf32> to vector<8x8x128xf32>
    %17 = arith.mulf %13, %16 : vector<8x8x128xf32>
    %18 = arith.addf %9, %17 : vector<8x8x128xf32>
    %c0_i32_11 = arith.constant 0 : i32
    %19 = arith.addi %0, %c0_i32_11 : i32
    %c0_12 = arith.constant 0 : index
    %c0_13 = arith.constant 0 : index
    %20 = arith.index_cast %19 : i32 to index
    %c1_14 = arith.constant 1 : index
    %c0_15 = arith.constant 0 : index
    %21 = vector.load %arg2[%c0_12, %c0_13, %20, %c1_14, %c0_15] : memref<4x1x9x16x128xf32, #tpu.memory_space<vmem>>, vector<1x1x8x8x128xf32>
    %22 = vector.shape_cast %21 : vector<1x1x8x8x128xf32> to vector<8x8x128xf32>
    %23 = vector.extract_strided_slice %1 {offsets = [2, 0, 0, 0], sizes = [1, 1, 1, 128], strides = [1, 1, 1, 1]} : vector<9x1x1x128xf32> to vector<1x1x1x128xf32>
    %24 = vector.shape_cast %23 : vector<1x1x1x128xf32> to vector<1x1x128xf32>
    %25 = vector.broadcast %24 : vector<1x1x128xf32> to vector<8x8x128xf32>
    %26 = arith.mulf %22, %25 : vector<8x8x128xf32>
    %27 = arith.addf %18, %26 : vector<8x8x128xf32>
    %c0_i32_16 = arith.constant 0 : i32
    %28 = arith.addi %0, %c0_i32_16 : i32
    %c2 = arith.constant 2 : index
    %c0_17 = arith.constant 0 : index
    %29 = arith.index_cast %28 : i32 to index
    %c0_18 = arith.constant 0 : index
    %c0_19 = arith.constant 0 : index
    %30 = vector.load %arg2[%c2, %c0_17, %29, %c0_18, %c0_19] : memref<4x1x9x16x128xf32, #tpu.memory_space<vmem>>, vector<1x1x8x8x128xf32>
    %31 = vector.shape_cast %30 : vector<1x1x8x8x128xf32> to vector<8x8x128xf32>
    %32 = vector.extract_strided_slice %1 {offsets = [3, 0, 0, 0], sizes = [1, 1, 1, 128], strides = [1, 1, 1, 1]} : vector<9x1x1x128xf32> to vector<1x1x1x128xf32>
    %33 = vector.shape_cast %32 : vector<1x1x1x128xf32> to vector<1x1x128xf32>
    %34 = vector.broadcast %33 : vector<1x1x128xf32> to vector<8x8x128xf32>
    %35 = arith.mulf %31, %34 : vector<8x8x128xf32>
    %36 = arith.addf %27, %35 : vector<8x8x128xf32>
    %c0_i32_20 = arith.constant 0 : i32
    %37 = arith.addi %0, %c0_i32_20 : i32
    %c3 = arith.constant 3 : index
    %c0_21 = arith.constant 0 : index
    %38 = arith.index_cast %37 : i32 to index
    %c0_22 = arith.constant 0 : index
    %c0_23 = arith.constant 0 : index
    %39 = vector.load %arg2[%c3, %c0_21, %38, %c0_22, %c0_23] : memref<4x1x9x16x128xf32, #tpu.memory_space<vmem>>, vector<1x1x8x8x128xf32>
    %40 = vector.shape_cast %39 : vector<1x1x8x8x128xf32> to vector<8x8x128xf32>
    %41 = vector.extract_strided_slice %1 {offsets = [4, 0, 0, 0], sizes = [1, 1, 1, 128], strides = [1, 1, 1, 1]} : vector<9x1x1x128xf32> to vector<1x1x1x128xf32>
    %42 = vector.shape_cast %41 : vector<1x1x1x128xf32> to vector<1x1x128xf32>
    %43 = vector.broadcast %42 : vector<1x1x128xf32> to vector<8x8x128xf32>
    %44 = arith.mulf %40, %43 : vector<8x8x128xf32>
    %45 = arith.addf %36, %44 : vector<8x8x128xf32>
    %c0_i32_24 = arith.constant 0 : i32
    %46 = arith.addi %0, %c0_i32_24 : i32
    %c2_25 = arith.constant 2 : index
    %c0_26 = arith.constant 0 : index
    %47 = arith.index_cast %46 : i32 to index
    %c1_27 = arith.constant 1 : index
    %c0_28 = arith.constant 0 : index
    %48 = vector.load %arg2[%c2_25, %c0_26, %47, %c1_27, %c0_28] : memref<4x1x9x16x128xf32, #tpu.memory_space<vmem>>, vector<1x1x8x8x128xf32>
    %49 = vector.shape_cast %48 : vector<1x1x8x8x128xf32> to vector<8x8x128xf32>
    %50 = vector.extract_strided_slice %1 {offsets = [5, 0, 0, 0], sizes = [1, 1, 1, 128], strides = [1, 1, 1, 1]} : vector<9x1x1x128xf32> to vector<1x1x1x128xf32>
    %51 = vector.shape_cast %50 : vector<1x1x1x128xf32> to vector<1x1x128xf32>
    %52 = vector.broadcast %51 : vector<1x1x128xf32> to vector<8x8x128xf32>
    %53 = arith.mulf %49, %52 : vector<8x8x128xf32>
    %54 = arith.addf %45, %53 : vector<8x8x128xf32>
    %c1_i32 = arith.constant 1 : i32
    %55 = arith.addi %0, %c1_i32 : i32
    %c0_29 = arith.constant 0 : index
    %c0_30 = arith.constant 0 : index
    %56 = arith.index_cast %55 : i32 to index
    %c0_31 = arith.constant 0 : index
    %c0_32 = arith.constant 0 : index
    %57 = vector.load %arg2[%c0_29, %c0_30, %56, %c0_31, %c0_32] : memref<4x1x9x16x128xf32, #tpu.memory_space<vmem>>, vector<1x1x8x8x128xf32>
    %58 = vector.shape_cast %57 : vector<1x1x8x8x128xf32> to vector<8x8x128xf32>
    %59 = vector.extract_strided_slice %1 {offsets = [6, 0, 0, 0], sizes = [1, 1, 1, 128], strides = [1, 1, 1, 1]} : vector<9x1x1x128xf32> to vector<1x1x1x128xf32>
    %60 = vector.shape_cast %59 : vector<1x1x1x128xf32> to vector<1x1x128xf32>
    %61 = vector.broadcast %60 : vector<1x1x128xf32> to vector<8x8x128xf32>
    %62 = arith.mulf %58, %61 : vector<8x8x128xf32>
    %63 = arith.addf %54, %62 : vector<8x8x128xf32>
    %c1_i32_33 = arith.constant 1 : i32
    %64 = arith.addi %0, %c1_i32_33 : i32
    %c1_34 = arith.constant 1 : index
    %c0_35 = arith.constant 0 : index
    %65 = arith.index_cast %64 : i32 to index
    %c0_36 = arith.constant 0 : index
    %c0_37 = arith.constant 0 : index
    %66 = vector.load %arg2[%c1_34, %c0_35, %65, %c0_36, %c0_37] : memref<4x1x9x16x128xf32, #tpu.memory_space<vmem>>, vector<1x1x8x8x128xf32>
    %67 = vector.shape_cast %66 : vector<1x1x8x8x128xf32> to vector<8x8x128xf32>
    %68 = vector.extract_strided_slice %1 {offsets = [7, 0, 0, 0], sizes = [1, 1, 1, 128], strides = [1, 1, 1, 1]} : vector<9x1x1x128xf32> to vector<1x1x1x128xf32>
    %69 = vector.shape_cast %68 : vector<1x1x1x128xf32> to vector<1x1x128xf32>
    %70 = vector.broadcast %69 : vector<1x1x128xf32> to vector<8x8x128xf32>
    %71 = arith.mulf %67, %70 : vector<8x8x128xf32>
    %72 = arith.addf %63, %71 : vector<8x8x128xf32>
    %c1_i32_38 = arith.constant 1 : i32
    %73 = arith.addi %0, %c1_i32_38 : i32
    %c0_39 = arith.constant 0 : index
    %c0_40 = arith.constant 0 : index
    %74 = arith.index_cast %73 : i32 to index
    %c1_41 = arith.constant 1 : index
    %c0_42 = arith.constant 0 : index
    %75 = vector.load %arg2[%c0_39, %c0_40, %74, %c1_41, %c0_42] : memref<4x1x9x16x128xf32, #tpu.memory_space<vmem>>, vector<1x1x8x8x128xf32>
    %76 = vector.shape_cast %75 : vector<1x1x8x8x128xf32> to vector<8x8x128xf32>
    %77 = vector.extract_strided_slice %1 {offsets = [8, 0, 0, 0], sizes = [1, 1, 1, 128], strides = [1, 1, 1, 1]} : vector<9x1x1x128xf32> to vector<1x1x1x128xf32>
    %78 = vector.shape_cast %77 : vector<1x1x1x128xf32> to vector<1x1x128xf32>
    %79 = vector.broadcast %78 : vector<1x1x128xf32> to vector<8x8x128xf32>
    %80 = arith.mulf %76, %79 : vector<8x8x128xf32>
    %81 = arith.addf %72, %80 : vector<8x8x128xf32>
    %c0_43 = arith.constant 0 : index
    %c0_44 = arith.constant 0 : index
    %c0_45 = arith.constant 0 : index
    %82 = vector.load %arg4[%c0_43, %c0_44, %c0_45] : memref<1x1x128xf32, #tpu.memory_space<vmem>>, vector<1x1x128xf32>
    %83 = vector.broadcast %82 : vector<1x1x128xf32> to vector<8x8x128xf32>
    %84 = arith.addf %81, %83 : vector<8x8x128xf32>
    %cst = arith.constant 0.000000e+00 : f32
    %85 = vector.broadcast %cst : f32 to vector<8x8x128xf32>
    %86 = arith.maximumf %84, %85 : vector<8x8x128xf32>
    %87 = vector.shape_cast %86 : vector<8x8x128xf32> to vector<64x128xf32>
    %c0_46 = arith.constant 0 : index
    %c0_47 = arith.constant 0 : index
    %88 = vector.load %arg5[%c0_46, %c0_47] : memref<128x128xf32, #tpu.memory_space<vmem>>, vector<128x128xf32>
    %cst_48 = arith.constant dense<0.000000e+00> : vector<64x128xf32>
    %89 = tpu.matmul %87, %88, %cst_48 {dimension_numbers = #tpu.dot_dimension_numbers<[1], [0], [0], [1], [0, 0, 1, 1], [], []>} : vector<64x128xf32>, vector<128x128xf32>, vector<64x128xf32> -> vector<64x128xf32>
    %c0_49 = arith.constant 0 : index
    %c0_50 = arith.constant 0 : index
    %90 = vector.load %arg6[%c0_49, %c0_50] : memref<1x128xf32, #tpu.memory_space<vmem>>, vector<1x128xf32>
    %91 = vector.broadcast %90 : vector<1x128xf32> to vector<64x128xf32>
    %92 = arith.addf %89, %91 : vector<64x128xf32>
    %cst_51 = arith.constant 0.000000e+00 : f32
    %93 = vector.broadcast %cst_51 : f32 to vector<64x128xf32>
    %94 = arith.maximumf %92, %93 : vector<64x128xf32>
    %95 = vector.shape_cast %94 : vector<64x128xf32> to vector<8x8x128xf32>
    %c0_52 = arith.constant 0 : index
    %c0_53 = arith.constant 0 : index
    %c0_54 = arith.constant 0 : index
    %c0_55 = arith.constant 0 : index
    %96 = vector.load %arg7[%c0_52, %c0_53, %c0_54, %c0_55] : memref<1x8x8x128xf32, #tpu.memory_space<vmem>>, vector<1x8x8x128xf32>
    %97 = vector.shape_cast %96 : vector<1x8x8x128xf32> to vector<8x8x128xf32>
    %98 = vector.shape_cast %95 : vector<8x8x128xf32> to vector<1x8x8x128xf32>
    tpu.vector_store %arg7[%c0_52, %c0_53, %c0_54, %c0_55], %98 {strides = array<i32>} : memref<1x8x8x128xf32, #tpu.memory_space<vmem>>, vector<1x8x8x128xf32>,
    return
  }
  func.func @transform_0(%arg0: i32, %arg1: i32) -> (i32, i32, i32, i32, i32) {
    %c0_i32 = arith.constant 0 : i32
    %c0_i32_0 = arith.constant 0 : i32
    %c0_i32_1 = arith.constant 0 : i32
    %c0_i32_2 = arith.constant 0 : i32
    %c0_i32_3 = arith.constant 0 : i32
    return %c0_i32, %arg0, %c0_i32_0, %c0_i32_1, %c0_i32_2 : i32, i32, i32, i32, i32
  }
  func.func @transform_1(%arg0: i32, %arg1: i32) -> (i32, i32, i32, i32) {
    %c0_i32 = arith.constant 0 : i32
    %c0_i32_0 = arith.constant 0 : i32
    %c0_i32_1 = arith.constant 0 : i32
    %c0_i32_2 = arith.constant 0 : i32
    %c0_i32_3 = arith.constant 0 : i32
    return %c0_i32, %c0_i32_0, %c0_i32_1, %c0_i32_2 : i32, i32, i32, i32
  }
  func.func @transform_2(%arg0: i32, %arg1: i32) -> (i32, i32, i32) {
    %c0_i32 = arith.constant 0 : i32
    %c0_i32_0 = arith.constant 0 : i32
    %c0_i32_1 = arith.constant 0 : i32
    %c0_i32_2 = arith.constant 0 : i32
    return %c0_i32, %c0_i32_0, %c0_i32_1 : i32, i32, i32
  }
  func.func @transform_3(%arg0: i32, %arg1: i32) -> (i32, i32) {
    %c0_i32 = arith.constant 0 : i32
    %c0_i32_0 = arith.constant 0 : i32
    %c0_i32_1 = arith.constant 0 : i32
    return %c0_i32, %c0_i32_0 : i32, i32
  }
  func.func @transform_4(%arg0: i32, %arg1: i32) -> (i32, i32) {
    %c0_i32 = arith.constant 0 : i32
    %c0_i32_0 = arith.constant 0 : i32
    %c0_i32_1 = arith.constant 0 : i32
    return %c0_i32, %c0_i32_0 : i32, i32
  }
  func.func @transform_5(%arg0: i32, %arg1: i32) -> (i32, i32, i32, i32) {
    %c0_i32 = arith.constant 0 : i32
    %c0_i32_0 = arith.constant 0 : i32
    %c0_i32_1 = arith.constant 0 : i32
    return %arg0, %arg1, %c0_i32, %c0_i32_0 : i32, i32, i32, i32
  }
}

</mosaic_0001>

<bundles_post_ra>
// kernel: tpu_custom_call.1
= control target key start
LH: loop header
LB: loop body
LE: loop exit
PB: predicated region body
PF: predicated region fallthrough
CT: control target
= control target key end

     0   :  { %10 = vsyncpa [#allocation3], 0  ;;  %s1828_s0 = inlined_call_operand.hbm [shape: f32[4,2,9,16,128], index: 0, kind: input, shape index: {}]   ;;  %s1829_s1 = inlined_call_operand.hbm [shape: f32[9,1,1,128], index: 1, kind: input, shape index: {}]   ;;  %s1830_s2 = inlined_call_operand.vmem [shape: f32[1,1,128], index: 2, kind: input, shape index: {}]   ;;  %s1831_s3 = inlined_call_operand.hbm [shape: f32[128,128], index: 3, kind: input, shape index: {}]   ;;  %s1832_s4 = inlined_call_operand.vmem [shape: f32[1,128], index: 4, kind: input, shape index: {}]   ;;  %s1833_s5 = inlined_call_operand.hbm [shape: f32[2,8,8,128], index: 5, kind: output, shape index: {}]  }
   0x1   :  { %12 = vsyncpa [#allocation3 + $0x1], 0 }
   0x2   :  { %13 = vsyncpa [#allocation6], 0 }
   0x3   :  { %14 = vsyncpa [#allocation4], 0 }
   0x4   :  { %16 = vsyncpa [#allocation4 + $0x1], 0  ;;  %s1393_s18 = smov 0   ;;  %s1395_s19 = smov 0  }
   0x5   :  { %s1397_s20 = smov 0   ;;  %s1399_s21 = smov 0  }
   0x6   :  { %s1401_s22 = smov 0   ;;  %s1403_s23 = smov 0  }
   0x7 LB: > { %s902_s24 = sadd.s32 4294967295, %s1346_s23   ;;  %s903_s25 = sadd.s32 4294967294, %s1346_s23   ;;  %s1346_s23 = sphi %s1403_s23, %s22_s23   ;;  %s1342_s22 = sphi %s1401_s22, %s1861_s22   ;;  %s1338_s21 = sphi %s1399_s21, %s1860_s21   ;;  %s1334_s20 = sphi %s1397_s20, %s1859_s20   ;;  %s1330_s19 = sphi %s1395_s19, %s1858_s19   ;;  %s1326_s18 = sphi %s1393_s18, %s1857_s18  }
   0x8   : > { %s34_s26 = sadd.s32 1, %s1342_s22  ;;  %s41_s27 = sadd.s32 1, %s1334_s20 }
   0x9   : > { %p36_p0 = scmp.ge.s32.totalorder %s34_s26, 2  ;;  %p48_p1 = scmp.ne.s32.totalorder %s1334_s20, %s1330_s19 }
   0xa   : > { %p49_p2 = scmp.eq.s32.totalorder %s1346_s23, 0  ;;  %p54_p3 = scmp.ne.s32.totalorder %s1330_s19, %s1326_s18 }
   0xb   : > { %s1863_s26 = smov (%p36_p0, %s34_s26), 0  ;;  %p1438_p5 = scmp.eq.s32.totalorder %s902_s24, 0 }
   0xc   : > { %1840 = sst [smem:[#allocation15_spill]] %s1863_s26  ;;  %p1434_p4 = por %p49_p2, %p48_p1 }
   0xd   : > { %s1842_s29 = scalar_select %p1438_p5, 1, 0 }
   0xe   : > { %s38_s30 = ssub.s32 %s1342_s22, %s1863_s26  ;;  %p164_p6 = scmp.eq.s32.totalorder %s902_s24, 1 }
   0xf   : > { %p39_p7 = scmp.eq.s32.totalorder %s38_s30, 0  ;;  %p1446_p8 = por %p1438_p5, %p54_p3 }
  0x10   : > { %p1450_p9 = por %p164_p6, %p48_p1  ;;  %p170_p10 = scmp.eq.s32.totalorder %s903_s25, 1 }
  0x11   : > { %s1843_s6 = scalar_select %p1446_p8, 1, 0 }
  0x12   : > { %s1844_s7 = scalar_select %p1450_p9, 1, 0 }
  0x13   : > { %s1455_s8 = scalar_select %p39_p7, %s1334_s20, %s41_s27  }
  0x14   : > { %p1457_p11 = por %p170_p10, %p54_p3  ;;  %p904_p12 = scmp.ge.s32.totalorder %s1346_s23, 1 }
  0x15   : > { %1845 = sst [smem:[#allocation16_spill]] %s1455_s8  ;;  %p177_p13 = scmp.lt.s32.totalorder %s1346_s23, 3 }
  0x16   : > { %s1846_s9 = scalar_select %p1457_p11, 1, 0 }
  0x17   : > { %p1463_p0 = pnand %p904_p12, %p177_p13  ;;  %s1348_s11 = smov [#allocation5]  }
  0x18   : > { %1847 = sst [smem:[#allocation17_spill]] %s1846_s9  ;;  %s189_s12 = sshll.u32 %s1348_s11, 4  ;;  %s1467_s12 = int_to_ptr.vmem [resolvable:$true] %s189_s12 }
  0x19   : > { %p1126_p1 = pneg %p1463_p0  ;;  %s1349_s13 = smov [#allocation7]  }
  0x1a   : > { %s205_s14 = sshll.u32 %s1349_s13, 4  ;;  %s1204_s24 = scalar_lea.hbm %s1829_s1, 144  ;;  %s1477_s14 = int_to_ptr.vmem [resolvable:$true] %s205_s14 }
  0x1b   : > { %p1473_p2 = pnand %p1126_p1, %p1438_p5  ;;  %p1205_p3 = scmp.ne.s32.totalorder %s1829_s1, %s1204_s24 }
  0x1c   : > { %p1211_p12 = scmp.lt.u32.totalorder %s1204_s24, %s1829_s1 }
  0x1d   : > { %p1206_p6 = pneg %p1473_p2 }
  0x1f   : > { %p1207_p7 = pnand %p1206_p6, %p1205_p3 }
  0x21   : > { %p1208_p10 = pneg %p1207_p7 }
  0x23   : > { %p1213_p13 = pnand %p1211_p12, %p1208_p10 }
  0x25   : > { %1216 = shalt.err (!%p1213_p13)
}
  0x26   : > { %s1217_s13 = scalar_lea.vmem %s1467_s12, 144  ;;  %s1224_s16 = scalar_lea.vmem %s1467_s12, 160 }
  0x27   : > { %p1218_p1 = scmp.ne.s32.totalorder %s1467_s12, %s1217_s13  ;;  %p1225_p3 = scmp.lt.s32.totalorder %s1467_s12, %s1467_s12 }
  0x28   : > { %p1226_p7 = scmp.lt.s32.totalorder %s1224_s16, %s1217_s13 }
  0x29   : > { %p1220_p11 = pnand %p1218_p1, %p1206_p6 }
  0x2a   : > { %p1227_p5 = por %p1226_p7, %p1225_p3 }
  0x2b   : > { %p1221_p9 = pneg %p1220_p11 }
  0x2d   : > { %p1228_p8 = pnand %p1227_p5, %p1221_p9 }
  0x2f   : > { %1231 = shalt.err (!%p1228_p8)
}
  0x30   : > { %s1350_s17 = smov 16   ;;  %s1351_s24 = smov 1  }
  0x31   : > { %1129 = dma.hbm_to_vmem [thread:$0]  (!%p1473_p2), %s1829_s1, 144, %s1467_s12, [#allocation6], %s1350_s17, %s1350_s17, %s1351_s24  }
  0x32   : > { %s1232_s26 = scalar_lea.hbm %s1831_s3, 2048 }
  0x33   : > { %p1233_p11 = scmp.ne.s32.totalorder %s1831_s3, %s1232_s26  ;;  %p1239_p9 = scmp.lt.u32.totalorder %s1232_s26, %s1831_s3 }
  0x35   : > { %p1235_p5 = pnand %p1233_p11, %p1206_p6 }
  0x37   : > { %p1236_p8 = pneg %p1235_p5 }
  0x39   : > { %p1241_p10 = pnand %p1239_p9, %p1236_p8 }
  0x3b   : > { %1244 = shalt.err (!%p1241_p10)
}
  0x3c   : > { %s1245_s12 = scalar_lea.vmem %s1477_s14, 2048  ;;  %p1253_p3 = scmp.lt.s32.totalorder %s1477_s14, %s1477_s14 }
  0x3d   : > { %p1246_p12 = scmp.ne.s32.totalorder %s1477_s14, %s1245_s12  ;;  %p1254_p7 = scmp.lt.s32.totalorder %s1245_s12, %s1245_s12 }
  0x3f   : > { %p1248_p13 = pnand %p1246_p12, %p1206_p6  ;;  %p1255_p11 = por %p1254_p7, %p1253_p3 }
  0x41   : > { %p1249_p1 = pneg %p1248_p13 }
  0x43   : > { %p1256_p5 = pnand %p1255_p11, %p1249_p1 }
  0x45   : > { %1259 = shalt.err (!%p1256_p5)
}
  0x46   : > { %s1352_s8 = smov 128   ;;  %s1353_s26 = smov 8  }
  0x47   : > { %1132 = dma.hbm_to_vmem [thread:$0]  (!%p1473_p2), %s1831_s3, 2048, %s1477_s14, [#allocation6], %s1352_s8, %s1352_s8, %s1353_s26  }
  0x48   : > { %p907_p8 = scmp.ge.s32.totalorder %s1346_s23, 2 }
  0x4a   : > { %218 = sbr.rel (%p907_p8) target bundleno = 95 (0x5f), region = 32 }
  0x51   : > { %s222_s24 = sand.u32 1, %s1334_s20   ;;  %s1105_s25 = smul.u32 2304, %s1342_s22 }
  0x52   : > { %s1104_s15 = smul.u32 576, %s222_s24  ;;  %s1354_s27 = smov 4608  }
  0x53   : > { %1112 = sst [smem:[#allocation10]] (%p1434_p4), %s1354_s27  ;;  %s232_s13 = scalar_lea.hbm %s1828_s0, %s1105_s25 }
  0x54   : > { %s1111_s14 = scalar_select %p1434_p4, [#allocation0], [#allocation11] }
  0x55   : > { %s226_s12 = scalar_lea.vmem [#allocation2], %s1104_s15  ;;  %s1355_s26 = smov 2304  }
  0x56   : > { %s237_s16 = sld [smem:[%s1111_s14]]   ;;  %s245_s8 = sshll.u32 %s226_s12, 4  ;;  %s246_s8 = int_to_ptr.vmem [resolvable:$true] %s245_s8 }
  0x57   : > { %1113 = sst [smem:[#allocation10 + $0x1]] (%p1434_p4), %s1355_s26  ;;  %s1356_s9 = smov 18  }
  0x58   : > { %1114 = sst [smem:[#allocation10 + $0x2]] (%p1434_p4), %s1356_s9  ;;  %s1357_s17 = smov 128  }
  0x59   : > { %1115 = sst [smem:[#allocation10 + $0x3]] (%p1434_p4), %s1357_s17  ;;  %s1358_s27 = smov 8  }
  0x5a   : > { %1116 = sst [smem:[#allocation10 + $0x4]] (%p1434_p4), %s1357_s17  ;;  %s223_s15 = scalar_lea.sflag [#allocation3], %s222_s24 }
  0x5b   : > { %1117 = sst [smem:[#allocation10 + $0x5]] (%p1434_p4), %s1358_s27  ;;  %s1359_s30 = smov [#allocation9]  }
  0x5c   : > { %s909_s25 = sshll.u32 %s237_s16, 26 }
  0x5d   : > { %s910_s14 = sadd.s32 134217728, %s909_s25 }
  0x5e   : > { %1118 = dma.general (%p1434_p4), %s232_s13, 9216, %s246_s8, %s223_s15, %s1359_s30, [#allocation10], %s910_s14, 0  }
  0x5f PF: > { %270 = sbr.rel (%p1463_p0) target bundleno = 401 (0x191), region = 40  ;;  %s1559_s11 = sand.u32 (!%p1463_p0), 1, %s1330_s19  }
  0x60   : > { %s1106_s12 = smul.u32 (!%p1463_p0), 576, %s1559_s11  ;;  %s273_s26 = scalar_lea.sflag (!%p1463_p0), [#allocation3], %s1559_s11 }
  0x61   : > { %p1850_p2 = scmp.ne.s32.totalorder (!%p1463_p0), %s1843_s6, 0 }
  0x62   : > { %s1563_s9 = scalar_lea.vmem (!%p1463_p0), [#allocation2], %s1106_s12 }
  0x66   : > { %1313 = dma.done.wait (%p1850_p2), %s273_s26, 9216  }
  0x67   : > { %1315 = vsyncadd (%p1850_p2), %s273_s26, 4294958080  ;;  %p1851_p4 = scmp.ne.s32.totalorder %s1842_s29, 0 }
  0x69   : > { %1317 = dma.done.wait (%p1851_p4), [#allocation6], 2192  }
  0x6a   : > { %1319 = vsyncadd (%p1851_p4), [#allocation6], 4294965104  ;;  %v620_v0 = vld [vmem:[#allocation7] sm:$0xff]  ;;  %v621_v1 = vld [vmem:[#allocation7 + $0x8] sm:$0xff]  ;;  %s914_s24 = sshll.u32 %s1559_s11, 6  ;;  %s987_s8 = sshll.u32 %s1338_s21, 10 }
  0x6b   : > { %v622_v2 = vld [vmem:[#allocation7 + $0x10] sm:$0xff]  ;;  %v1056_v3 = vpack.c.bf16 %v621_v1, %v620_v0  ;;  %v623_v4 = vld [vmem:[#allocation7 + $0x18] sm:$0xff]  ;;  %v624_v6 = vld [vmem:[#allocation7 + $0x20] sm:$0xff]  ;;  %s310_s13 = scalar_lea.vmem [#allocation8], %s914_s24  ;;  %s1779_s25 = scalar_lea.hbm %s1833_s5, %s987_s8 }
  0x6c   : > { %v1060_v5 = vpack.c.bf16 %v623_v4, %v622_v2  ;;  %v625_v7 = vld [vmem:[#allocation7 + $0x28] sm:$0xff]  ;;  %v626_v8 = vld [vmem:[#allocation7 + $0x30] sm:$0xff]  ;;  %v627_v9 = vld [vmem:[#allocation7 + $0x38] sm:$0xff]  ;;  %s780_s16 = sshll.u32 %s310_s13, 4  ;;  %s765_s21 = scalar_lea.sflag [#allocation4], %s1559_s11  ;;  %s1774_s16 = int_to_ptr.vmem [resolvable:$true] %s780_s16 }
  0x6d   : > { %1057 = vmatprep.subr.bf16.mxu0 %v1056_v3  ;;  %1088 = vmatprep.subr.bf16.mxu1 %v1056_v3  ;;  %v1064_v10 = vpack.c.bf16 %v625_v7, %v624_v6  ;;  %v628_v11 = vld [vmem:[#allocation7 + $0x40] sm:$0xff]  ;;  %v629_v12 = vld [vmem:[#allocation7 + $0x48] sm:$0xff]  ;;  %v630_v13 = vld [vmem:[#allocation7 + $0x50] sm:$0xff]  ;;  %v1068_v28 = vpack.c.bf16 %v627_v9, %v626_v8  ;;  %s1260_s14 = scalar_lea.vmem %s1774_s16, 1024  ;;  %p1852_p6 = scmp.ne.s32.totalorder %s1844_s7, 0 }
  0x6e   : > { %1059 = vmatpush3.bf16.msra.mxu0 %v1056_v3  ;;  %1096 = vmatpush3.bf16.msra.mxu1 %v1056_v3  ;;  %v631_v14 = vld [vmem:[#allocation7 + $0x58] sm:$0xff]  ;;  %v632_v15 = vld [vmem:[#allocation7 + $0x60] sm:$0xff]  ;;  %v633_v16 = vld [vmem:[#allocation7 + $0x68] sm:$0xff]  ;;  %v1594_v34 = vpack.c.bf16 %v629_v12, %v628_v11  ;;  %p1261_p0 = scmp.ne.s32.totalorder %s1774_s16, %s1260_s14  ;;  %s1360_s15 = smov [#allocation8]  }
  0x6f   : > { %1061 = vmatprep.subr.bf16.mxu0 %v1060_v5  ;;  %1089 = vmatprep.subr.bf16.mxu1 %v1060_v5  ;;  %v634_v17 = vld [vmem:[#allocation7 + $0x70] sm:$0xff]  ;;  %v635_v18 = vld [vmem:[#allocation7 + $0x78] sm:$0xff]  ;;  %v916_v27 = vld [vmem:[%s1563_s9 + $0x90] sm:$0xff]  ;;  %v1596_v35 = vpack.c.bf16 %v631_v14, %v630_v13  ;;  %v1598_v36 = vpack.c.bf16 %v633_v16, %v632_v15  ;;  %s1264_s30 = sshll.u32 %s1360_s15, 4  ;;  %s1265_s30 = int_to_ptr.vmem [resolvable:$false] %s1264_s30 }
  0x70   : > { %v1573_v19 = vld [vmem:[#allocation5] ss:$0 sm:$0xff]  ;;  %v1575_v20 = vld [vmem:[#allocation5 + $0x1] ss:$0 sm:$0xff]  ;;  %v1577_v21 = vld [vmem:[#allocation5 + $0x2] ss:$0 sm:$0xff]  ;;  %v1606_v41 = vpack.c.bf16 %v635_v18, %v634_v17  ;;  %p1262_p9 = pnand %p1261_p0, %p1852_p6  ;;  %p1267_p12 = scmp.lt.s32.totalorder %s1774_s16, %s1265_s30 }
  0x71   : > { %v1579_v22 = vld [vmem:[#allocation5 + $0x3] ss:$0 sm:$0xff]  ;;  %v1581_v23 = vld [vmem:[#allocation5 + $0x4] ss:$0 sm:$0xff]  ;;  %v1583_v24 = vld [vmem:[#allocation5 + $0x5] ss:$0 sm:$0xff]  ;;  %v362_v30 = vmul.f32 %v1575_v20, %v916_v27 }
  0x72   : > { %1063 = vmatpush3.bf16.msra.mxu0 %v1060_v5  ;;  %1097 = vmatpush3.bf16.msra.mxu1 %v1060_v5  ;;  %v1585_v25 = vld [vmem:[#allocation5 + $0x6] ss:$0 sm:$0xff]  ;;  %v935_v33 = vld [vmem:[%s1563_s9 + $0x1b0] sm:$0xff]  ;;  %v1600_v37 = vld [vmem:[#allocation5 + $0x7] ss:$0 sm:$0xff]  ;;  %p1263_p10 = pneg %p1262_p9  ;;  %s1266_s12 = scalar_lea.vmem %s1265_s30, 2048 }
  0x73   : > { %v324_v26 = vld [vmem:[%s1563_s9] sm:$0xff]  ;;  %1065 = vmatprep.subr.bf16.mxu0 %v1064_v10  ;;  %1090 = vmatprep.subr.bf16.mxu1 %v1064_v10  ;;  %v1602_v38 = vld [vmem:[#allocation5 + $0x8] ss:$0 sm:$0xff]  ;;  %v456_v44 = vmul.f32 %v1581_v23, %v935_v33  ;;  %v953_v45 = vld [vmem:[%s1563_s9 + $0x10] sm:$0xff]  ;;  %p1268_p13 = scmp.lt.s32.totalorder %s1266_s12, %s1260_s14 }
  0x74   : > { %v338_v29 = vmul.f32 %v1573_v19, %v324_v26  ;;  %v378_v31 = vld [vmem:[%s1563_s9 + $0x1] sm:$0xff]  ;;  %v519_v49 = vmul.f32 %v1585_v25, %v953_v45  ;;  %v1620_v51 = vld [vmem:[%s1563_s9 + $0xd0] sm:$0xff]  ;;  %v339_v63 = vmul.f32 %v953_v45, %v1573_v19 }
  0x75   : > { %v926_v32 = vld [vmem:[%s1563_s9 + $0x120] sm:$0xff]  ;;  %v392_v39 = vmul.f32 %v1577_v21, %v378_v31  ;;  %v971_v55 = vld [vmem:[%s1563_s9 + $0x11] sm:$0xff]  ;;  %v366_v56 = vmul.f32 %v1575_v20, %v1620_v51  ;;  %p1269_p1 = por %p1268_p13, %p1267_p12 }
  0x76   : > { %v944_v40 = vld [vmem:[%s1563_s9 + $0x121] sm:$0xff]  ;;  %v370_v42 = vadd.f32 %v362_v30, %v338_v29  ;;  %v424_v43 = vmul.f32 %v1579_v22, %v926_v32  ;;  %1067 = vmatpush3.bf16.msra.mxu0 %v1064_v10  ;;  %1098 = vmatpush3.bf16.msra.mxu1 %v1064_v10  ;;  %v939_v58 = vld [vmem:[%s1563_s9 + $0x1f0] sm:$0xff]  ;;  %v1635_v61 = vmul.f32 %v1602_v38, %v971_v55 }
  0x77   : > { %v962_v46 = vld [vmem:[%s1563_s9 + $0xa0] sm:$0xff]  ;;  %v486_v48 = vmul.f32 %v1583_v24, %v944_v40  ;;  %1069 = vmatprep.subr.bf16.mxu0 %v1068_v28  ;;  %1091 = vmatprep.subr.bf16.mxu1 %v1068_v28  ;;  %v460_v2 = vmul.f32 %v1581_v23, %v939_v58  ;;  %v957_v4 = vld [vmem:[%s1563_s9 + $0x50] sm:$0xff]  ;;  %v393_v10 = vmul.f32 %v971_v55, %v1577_v21  ;;  %p1270_p3 = pnand %p1269_p1, %p1263_p10 }
  0x78   : > { %v1613_v47 = vld [vmem:[%s1563_s9 + $0x40] sm:$0xff]  ;;  %v400_v54 = vadd.f32 %v392_v39, %v370_v42  ;;  %v551_v60 = vmul.f32 %v1600_v37, %v962_v46  ;;  %v927_v5 = vld [vmem:[%s1563_s9 + $0x130] sm:$0xff]  ;;  %v523_v7 = vmul.f32 %v1585_v25, %v957_v4  ;;  %v363_v9 = vmul.f32 %v962_v46, %v1575_v20 }
  0x79   : > { %v342_v50 = vmul.f32 %v1573_v19, %v1613_v47  ;;  %v1623_v52 = vld [vmem:[%s1563_s9 + $0x41] sm:$0xff]  ;;  %v945_v11 = vld [vmem:[%s1563_s9 + $0x131] sm:$0xff]  ;;  %v425_v18 = vmul.f32 %v1579_v22, %v927_v5  ;;  %v343_v30 = vmul.f32 %v957_v4, %v1573_v19 }
  0x7a   : > { %v930_v53 = vld [vmem:[%s1563_s9 + $0x160] sm:$0xff]  ;;  %v396_v57 = vmul.f32 %v1577_v21, %v1623_v52  ;;  %v432_v0 = vadd.f32 %v424_v43, %v400_v54  ;;  %1071 = vmatpush3.bf16.msra.mxu0 %v1068_v28  ;;  %1099 = vmatpush3.bf16.msra.mxu1 %v1068_v28  ;;  %v975_v15 = vld [vmem:[%s1563_s9 + $0x51] sm:$0xff]  ;;  %v371_v17 = vadd.f32 %v363_v9, %v339_v63 }
  0x7b   : > { %v948_v59 = vld [vmem:[%s1563_s9 + $0x161] sm:$0xff]  ;;  %v428_v62 = vmul.f32 %v1579_v22, %v930_v53  ;;  %v374_v1 = vadd.f32 %v366_v56, %v342_v50  ;;  %1073 = vmatprep.subr.bf16.mxu0 %v1594_v34  ;;  %1092 = vmatprep.subr.bf16.mxu1 %v1594_v34  ;;  %v1654_v16 = vmul.f32 %v1602_v38, %v975_v15  ;;  %v931_v31 = vld [vmem:[%s1563_s9 + $0x170] sm:$0xff] }
  0x7c   : > { %v490_v3 = vmul.f32 %v1583_v24, %v948_v59  ;;  %v936_v6 = vld [vmem:[%s1563_s9 + $0x1c0] sm:$0xff]  ;;  %v464_v12 = vadd.f32 %v456_v44, %v432_v0  ;;  %v487_v29 = vmul.f32 %v1583_v24, %v945_v11  ;;  %v401_v32 = vadd.f32 %v393_v10, %v371_v17  ;;  %v963_v46 = vld [vmem:[%s1563_s9 + $0xb0] sm:$0xff] }
  0x7d   : > { %v966_v8 = vld [vmem:[%s1563_s9 + $0xe0] sm:$0xff]  ;;  %v404_v13 = vadd.f32 %v396_v57, %v374_v1  ;;  %v457_v26 = vmul.f32 %v1581_v23, %v936_v6  ;;  %v397_v40 = vmul.f32 %v975_v15, %v1577_v21  ;;  %v429_v55 = vmul.f32 %v1579_v22, %v931_v31  ;;  %v967_v15 = vld [vmem:[%s1563_s9 + $0xf0] sm:$0xff] }
  0x7e   : > { %v555_v14 = vmul.f32 %v1600_v37, %v966_v8  ;;  %v494_v27 = vadd.f32 %v486_v48, %v464_v12  ;;  %1075 = vmatpush3.bf16.msra.mxu0 %v1594_v34  ;;  %1100 = vmatpush3.bf16.msra.mxu1 %v1594_v34  ;;  %v954_v33 = vld [vmem:[%s1563_s9 + $0x20] sm:$0xff]  ;;  %v367_v39 = vmul.f32 %v966_v8, %v1575_v20  ;;  %v949_v48 = vld [vmem:[%s1563_s9 + $0x171] sm:$0xff] }
  0x7f   : > { %v436_v28 = vadd.f32 %v428_v62, %v404_v13  ;;  %v940_v42 = vld [vmem:[%s1563_s9 + $0x200] sm:$0xff]  ;;  %1077 = vmatprep.subr.bf16.mxu0 %v1596_v35  ;;  %1093 = vmatprep.subr.bf16.mxu1 %v1596_v35  ;;  %v520_v45 = vmul.f32 %v1585_v25, %v954_v33  ;;  %v433_v50 = vadd.f32 %v425_v18, %v401_v32 }
  0x80   : > { %v527_v43 = vadd.f32 %v519_v49, %v494_v27  ;;  %v552_v34 = vmul.f32 %v1600_v37, %v963_v46  ;;  %v972_v53 = vld [vmem:[%s1563_s9 + $0x21] sm:$0xff]  ;;  %v375_v54 = vadd.f32 %v367_v39, %v343_v30  ;;  %v461_v49 = vmul.f32 %v1581_v23, %v940_v42  ;;  %v1682_v59 = vld [vmem:[%s1830_s2] ss:$0 sm:$0xff] }
  0x81   : > { %v468_v44 = vadd.f32 %v460_v2, %v436_v28  ;;  %v582_v58 = vmul.f32 %v1602_v38, %v972_v53  ;;  %v465_v62 = vadd.f32 %v457_v26, %v433_v50  ;;  %v491_v0 = vmul.f32 %v1583_v24, %v949_v48  ;;  %v958_v5 = vld [vmem:[%s1563_s9 + $0x60] sm:$0xff]  ;;  %v955_v50 = vld [vmem:[%s1563_s9 + $0x30] sm:$0xff] }
  0x82   : > { %v559_v56 = vadd.f32 %v551_v60, %v527_v43  ;;  %1079 = vmatpush3.bf16.msra.mxu0 %v1596_v35  ;;  %1101 = vmatpush3.bf16.msra.mxu1 %v1596_v35  ;;  %v405_v63 = vadd.f32 %v397_v40, %v375_v54  ;;  %v928_v60 = vld [vmem:[%s1563_s9 + $0x140] sm:$0xff]  ;;  %v340_v35 = vmul.f32 %v954_v33, %v1573_v19 }
  0x83   : > { %v498_v57 = vadd.f32 %v490_v3, %v468_v44  ;;  %1081 = vmatprep.subr.bf16.mxu0 %v1598_v36  ;;  %1094 = vmatprep.subr.bf16.mxu1 %v1598_v36  ;;  %v495_v3 = vadd.f32 %v487_v29, %v465_v62  ;;  %v364_v6 = vmul.f32 %v963_v46, %v1575_v20  ;;  %v976_v17 = vld [vmem:[%s1563_s9 + $0x61] sm:$0xff]  ;;  %v941_v46 = vld [vmem:[%s1563_s9 + $0x210] sm:$0xff] }
  0x84   : > { %v589_v1 = vadd.f32 %v1635_v61, %v559_v56  ;;  %v437_v4 = vadd.f32 %v429_v55, %v405_v63  ;;  %v394_v8 = vmul.f32 %v972_v53, %v1577_v21  ;;  %v524_v11 = vmul.f32 %v1585_v25, %v958_v5  ;;  %v946_v26 = vld [vmem:[%s1563_s9 + $0x141] sm:$0xff]  ;;  %v973_v62 = vld [vmem:[%s1563_s9 + $0x31] sm:$0xff] }
  0x85   : > { %v531_v2 = vadd.f32 %v523_v7, %v498_v57  ;;  %v426_v61 = vmul.f32 %v1579_v22, %v928_v60  ;;  %v937_v7 = vld [vmem:[%s1563_s9 + $0x1d0] sm:$0xff]  ;;  %v528_v12 = vadd.f32 %v520_v45, %v495_v3  ;;  %v372_v18 = vadd.f32 %v364_v6, %v340_v35  ;;  %v932_v33 = vld [vmem:[%s1563_s9 + $0x180] sm:$0xff] }
  0x86   : > { %v604_v9 = vadd.f32 %v1682_v59, %v589_v1  ;;  %1083 = vmatpush3.bf16.msra.mxu0 %v1598_v36  ;;  %1102 = vmatpush3.bf16.msra.mxu1 %v1598_v36  ;;  %v469_v13 = vadd.f32 %v461_v49, %v437_v4  ;;  %v556_v28 = vmul.f32 %v1600_v37, %v967_v15  ;;  %v950_v55 = vld [vmem:[%s1563_s9 + $0x181] sm:$0xff]  ;;  %v929_v4 = vld [vmem:[%s1563_s9 + $0x150] sm:$0xff] }
  0x87   : > { %v563_v10 = vadd.f32 %v555_v14, %v531_v2  ;;  %1085 = vmatprep.subr.bf16.mxu0 %v1606_v41  ;;  %1095 = vmatprep.subr.bf16.mxu1 %v1606_v41  ;;  %v586_v29 = vmul.f32 %v1602_v38, %v976_v17  ;;  %v560_v36 = vadd.f32 %v552_v34, %v528_v12  ;;  %v959_v12 = vld [vmem:[%s1563_s9 + $0x70] sm:$0xff] }
  0x88   : > { %v612_v14 = vmax.f32 %v604_v9, 0.0  ;;  %v499_v30 = vadd.f32 %v491_v0, %v469_v13  ;;  %v402_v31 = vadd.f32 %v394_v8, %v372_v18  ;;  %v458_v32 = vmul.f32 %v1581_v23, %v937_v7  ;;  %v968_v13 = vld [vmem:[%s1563_s9 + $0x100] sm:$0xff]  ;;  %v977_v18 = vld [vmem:[%s1563_s9 + $0x71] sm:$0xff] }
  0x89   : > { %v593_v27 = vadd.f32 %v1654_v16, %v563_v10  ;;  %v488_v40 = vmul.f32 %v1583_v24, %v946_v26  ;;  %v344_v16 = vmul.f32 %v958_v5, %v1573_v19  ;;  %v368_v42 = vmul.f32 %v967_v15, %v1575_v20  ;;  %v938_v10 = vld [vmem:[%s1563_s9 + $0x1e0] sm:$0xff] }
  0x8a   : > { %1044 = vmatprep.mubr.f32.mxu0 %v612_v14  ;;  %1087 = vmatpush3.bf16.msra.mxu0 %v1606_v41  ;;  %v590_v43 = vadd.f32 %v582_v58, %v560_v36  ;;  %v532_v44 = vadd.f32 %v524_v11, %v499_v30  ;;  %v434_v45 = vadd.f32 %v426_v61, %v402_v31  ;;  %v964_v58 = vld [vmem:[%s1563_s9 + $0xc0] sm:$0xff]  ;;  %v933_v31 = vld [vmem:[%s1563_s9 + $0x190] sm:$0xff] }
  0x8b   : > { %v608_v39 = vadd.f32 %v1682_v59, %v593_v27  ;;  %1103 = vmatpush3.bf16.msra.mxu1 %v1606_v41  ;;  %v376_v34 = vadd.f32 %v368_v42, %v344_v16  ;;  %v398_v53 = vmul.f32 %v976_v17, %v1577_v21  ;;  %v430_v54 = vmul.f32 %v1579_v22, %v932_v33  ;;  %v947_v27 = vld [vmem:[%s1563_s9 + $0x151] sm:$0xff] }
  0x8c   : > { %v605_v56 = vadd.f32 %v1682_v59, %v590_v43  ;;  %v564_v57 = vadd.f32 %v556_v28, %v532_v44  ;;  %v466_v49 = vadd.f32 %v458_v32, %v434_v45  ;;  %v521_v41 = vmul.f32 %v1585_v25, %v955_v50  ;;  %v942_v45 = vld [vmem:[%s1563_s9 + $0x220] sm:$0xff] }
  0x8d   : > { %v616_v48 = vmax.f32 %v608_v39, 0.0  ;;  %v553_v63 = vmul.f32 %v1600_v37, %v964_v58  ;;  %v406_v0 = vadd.f32 %v398_v53, %v376_v34  ;;  %v462_v60 = vmul.f32 %v1581_v23, %v941_v46 }
  0x8e   : > { %v613_v1 = vmax.f32 %v605_v56, 0.0  ;;  %v594_v2 = vadd.f32 %v586_v29, %v564_v57  ;;  %v496_v35 = vadd.f32 %v488_v40, %v466_v49  ;;  %v492_v3 = vmul.f32 %v1583_v24, %v950_v55 }
  0x8f   : > { %1050 = vmatprep.mubr.f32.mxu1 %v616_v48  ;;  %v438_v5 = vadd.f32 %v430_v54, %v406_v0  ;;  %v341_v6 = vmul.f32 %v955_v50, %v1573_v19  ;;  %v365_v8 = vmul.f32 %v964_v58, %v1575_v20  ;;  %v395_v9 = vmul.f32 %v973_v62, %v1577_v21  ;;  %v969_v0 = vld [vmem:[%s1563_s9 + $0x110] sm:$0xff] }
  0x90   : > { %1045 = vmatmul.mubr.f32.vlgmr.msra.gmra.mrb[0].mxu0 %v613_v1  ;;  %v609_v11 = vadd.f32 %v1682_v59, %v594_v2  ;;  %v529_v61 = vadd.f32 %v521_v41, %v496_v35  ;;  %v583_v7 = vmul.f32 %v1602_v38, %v973_v62  ;;  %v525_v17 = vmul.f32 %v1585_v25, %v959_v12  ;;  %v960_v41 = vld [vmem:[%s1563_s9 + $0x80] sm:$0xff] }
  0x91   : > { %v470_v15 = vadd.f32 %v462_v60, %v438_v5  ;;  %v373_v26 = vadd.f32 %v365_v8, %v341_v6  ;;  %v427_v14 = vmul.f32 %v1579_v22, %v929_v4  ;;  %v557_v36 = vmul.f32 %v1600_v37, %v968_v13  ;;  %v978_v35 = vld [vmem:[%s1563_s9 + $0x81] sm:$0xff] }
  0x92   : > { %v617_v28 = vmax.f32 %v609_v11, 0.0  ;;  %v561_v29 = vadd.f32 %v553_v63, %v529_v61  ;;  %v459_v30 = vmul.f32 %v1581_v23, %v938_v10  ;;  %v345_v39 = vmul.f32 %v959_v12, %v1573_v19 }
  0x93   : > { %v500_v32 = vadd.f32 %v492_v3, %v470_v15  ;;  %v403_v33 = vadd.f32 %v395_v9, %v373_v26  ;;  %v369_v40 = vmul.f32 %v968_v13, %v1575_v20  ;;  %v587_v42 = vmul.f32 %v1602_v38, %v977_v18  ;;  %v951_v20 = vld [vmem:[%s1563_s9 + $0x191] sm:$0xff] }
  0x94   : > { %1051 = vmatmul.mubr.f32.vlgmr.msra.gmra.mrb[0].mxu1 %v617_v28  ;;  %v591_v16 = vadd.f32 %v583_v7, %v561_v29  ;;  %v489_v43 = vmul.f32 %v1583_v24, %v947_v27  ;;  %v399_v44 = vmul.f32 %v977_v18, %v1577_v21  ;;  %v431_v34 = vmul.f32 %v1579_v22, %v933_v31  ;;  %v981_v7 = vld [vmem:[%s1832_s4] ss:$0 sm:$0xff] }
  0x95   : > { %v533_v46 = vadd.f32 %v525_v17, %v500_v32  ;;  %v435_v48 = vadd.f32 %v427_v14, %v403_v33  ;;  %v377_v50 = vadd.f32 %v369_v40, %v345_v39  ;;  %v522_v19 = vmul.f32 %v1585_v25, %v1613_v47 }
  0x96   : > { %v606_v53 = vadd.f32 %v1682_v59, %v591_v16  ;;  %v463_v57 = vmul.f32 %v1581_v23, %v942_v45  ;;  %v554_v49 = vmul.f32 %v1600_v37, %v1620_v51  ;;  %v493_v63 = vmul.f32 %v1583_v24, %v951_v20 }
  0x97   : > { %v565_v54 = vadd.f32 %v557_v36, %v533_v46  ;;  %v467_v55 = vadd.f32 %v459_v30, %v435_v48  ;;  %v407_v56 = vadd.f32 %v399_v44, %v377_v50  ;;  %v584_v47 = vmul.f32 %v1602_v38, %v1623_v52 }
  0x98   : > { %v614_v21 = vmax.f32 %v606_v53, 0.0  ;;  %v526_v23 = vmul.f32 %v1585_v25, %v960_v41  ;;  %v558_v5 = vmul.f32 %v1600_v37, %v969_v0  ;;  %v588_v8 = vmul.f32 %v1602_v38, %v978_v35 }
  0x99   : > { %v595_v58 = vadd.f32 %v587_v42, %v565_v54  ;;  %v497_v22 = vadd.f32 %v489_v43, %v467_v55  ;;  %v439_v62 = vadd.f32 %v431_v34, %v407_v56 }
  0x9a   : > { %1047 = vmatprep.mubr.f32.mxu0 %v614_v21 }
  0x9b   : > { %v610_v60 = vadd.f32 %v1682_v59, %v595_v58  ;;  %v530_v1 = vadd.f32 %v522_v19, %v497_v22  ;;  %v471_v2 = vadd.f32 %v463_v57, %v439_v62 }
  0x9d   : > { %v618_v3 = vmax.f32 %v610_v60, 0.0  ;;  %v562_v51 = vadd.f32 %v554_v49, %v530_v1  ;;  %v501_v4 = vadd.f32 %v493_v63, %v471_v2 }
  0x9f   : > { %1053 = vmatprep.mubr.f32.mxu1 %v618_v3  ;;  %v592_v24 = vadd.f32 %v584_v47, %v562_v51  ;;  %v534_v6 = vadd.f32 %v526_v23, %v501_v4 }
  0xa1   : > { %v607_v52 = vadd.f32 %v1682_v59, %v592_v24  ;;  %v566_v9 = vadd.f32 %v558_v5, %v534_v6 }
  0xa3   : > { %v615_v10 = vmax.f32 %v607_v52, 0.0  ;;  %v596_v11 = vadd.f32 %v588_v8, %v566_v9 }
  0xa5   : > { %1048 = vmatmul.mubr.f32.gmra.mrb[2].mxu0 %v615_v10  ;;  %v611_v25 = vadd.f32 %v1682_v59, %v596_v11 }
  0xa7   : > { %v619_v61 = vmax.f32 %v611_v25, 0.0 }
  0xa9   : > { %1054 = vmatmul.mubr.f32.gmra.mrb[2].mxu1 %v619_v61 }
 0x163   : > { %v1046_v37 = vpop.f32.mrb[0].mxu0 }
 0x164   : > { %v715_v12 = vadd.f32 %v1046_v37, %v981_v7  ;;  %v709_v13 = vpop.f32.mrb[1].mxu0 }
 0x165   : > { %v710_v15 = vadd.f32 %v981_v7, %v709_v13 }
 0x166   : > { %v749_v38 = vmax.f32 %v715_v12, 0.0 }
 0x167   : > { %v1052_v17 = vpop.f32.mrb[0].mxu1  ;;  %v748_v18 = vmax.f32 %v710_v15, 0.0 }
 0x168   : > { %757 = vst [vmem:[%s310_s13 + $0x8] sm:$0xff] %v749_v38  ;;  %v735_v26 = vadd.f32 %v1052_v17, %v981_v7  ;;  %v729_v14 = vpop.f32.mrb[1].mxu1 }
 0x169   : > { %756 = vst [vmem:[%s310_s13] sm:$0xff] %v748_v18  ;;  %v730_v59 = vadd.f32 %v981_v7, %v729_v14 }
 0x16a   : > { %v753_v27 = vmax.f32 %v735_v26, 0.0 }
 0x16b   : > { %v752_v28 = vmax.f32 %v730_v59, 0.0 }
 0x16c   : > { %761 = vst [vmem:[%s310_s13 + $0x28] sm:$0xff] %v753_v27 }
 0x16d   : > { %760 = vst [vmem:[%s310_s13 + $0x20] sm:$0xff] %v752_v28 }
 0x178   : > { %v1049_v29 = vpop.f32.mrb[2].mxu0 }
 0x179   : > { %v725_v36 = vadd.f32 %v1049_v29, %v981_v7  ;;  %v719_v30 = vpop.f32.mrb[3].mxu0 }
 0x17a   : > { %v720_v31 = vadd.f32 %v981_v7, %v719_v30 }
 0x17b   : > { %v751_v32 = vmax.f32 %v725_v36, 0.0 }
 0x17c   : > { %v1055_v33 = vpop.f32.mrb[2].mxu1  ;;  %v750_v39 = vmax.f32 %v720_v31, 0.0 }
 0x17d   : > { %759 = vst [vmem:[%s310_s13 + $0x18] sm:$0xff] %v751_v32  ;;  %v745_v40 = vadd.f32 %v1055_v33, %v981_v7  ;;  %v739_v16 = vpop.f32.mrb[3].mxu1 }
 0x17e   : > { %758 = vst [vmem:[%s310_s13 + $0x10] sm:$0xff] %v750_v39  ;;  %v740_v42 = vadd.f32 %v981_v7, %v739_v16 }
 0x17f   : > { %v755_v43 = vmax.f32 %v745_v40, 0.0 }
 0x180   : > { %v754_v44 = vmax.f32 %v740_v42, 0.0 }
 0x181   : > { %763 = vst [vmem:[%s310_s13 + $0x38] sm:$0xff] %v755_v43 }
 0x182   : > { %762 = vst [vmem:[%s310_s13 + $0x30] sm:$0xff] %v754_v44 }
 0x183   : > { %1273 = shalt.err (!%p1270_p3)
}
 0x184   : > { %s1274_s26 = scalar_lea.hbm %s1779_s25, 1024  ;;  %s1278_s29 = scalar_lea.hbm %s1833_s5, 2048 }
 0x185   : > { %p1275_p7 = scmp.ne.s32.totalorder %s1779_s25, %s1274_s26  ;;  %p1279_p2 = scmp.lt.u32.totalorder %s1779_s25, %s1833_s5 }
 0x186   : > { %p1280_p4 = scmp.lt.u32.totalorder %s1278_s29, %s1274_s26  ;;  %p1282_p9 = scmp.lt.u32.totalorder %s1274_s26, %s1779_s25 }
 0x187   : > { %p1276_p11 = pnand %p1275_p7, %p1852_p6 }
 0x188   : > { %p1281_p0 = por %p1280_p4, %p1279_p2 }
 0x189   : > { %p1277_p5 = pneg %p1276_p11 }
 0x18a   : > { %p1283_p10 = por %p1282_p9, %p1281_p0 }
 0x18c   : > { %p1284_p12 = pnand %p1283_p10, %p1277_p5 }
 0x18e   : > { %1287 = shalt.err (!%p1284_p12)
}
 0x18f   : > { %s1361_s24 = smov 128   ;;  %s1362_s13 = smov 8  }
 0x190   : > { %1124 = dma.vmem_to_hbm [thread:$0]  (%p1852_p6), %s1774_s16, 1024, %s1779_s25, %s765_s21, %s1361_s24, %s1361_s24, %s1362_s13  }
 0x191 PF: > { %s1853_s8 = sld [smem:[#allocation17_spill]]  ;;  %s795_s17 = sand.u32 1, %s1326_s18  }
 0x192   : > { %s796_s27 = scalar_lea.sflag [#allocation4], %s795_s17 }
 0x197   : > { %p1854_p13 = scmp.ne.s32.totalorder %s1853_s8, 0 }
 0x199   : > { %p1134_p1 = pnand %p907_p8, %p1854_p13 }
 0x19b   : > { %1321 = dma.done.wait (!%p1134_p1), %s796_s27, 1024  }
 0x19c   : > { %1323 = vsyncadd (!%p1134_p1), %s796_s27, 4294966272  ;;  %s22_s23 = sadd.s32 1, %s1346_s23   ;;  %s1855_s14 = sld [smem:[#allocation16_spill]] }
 0x19d   : > { %p19_p3 = scmp.ge.s32.totalorder %s22_s23, 4   ;;  %s1856_s7 = sld [smem:[#allocation15_spill]] }
 0x19e   : > { %s1857_s18 = smov %s1330_s19  ;;  %s1858_s19 = smov %s1334_s20 }
 0x19f   : > { %s1860_s21 = smov %s1342_s22  ;;  %21 = sbr.rel (!%p19_p3) target bundleno = 7 (0x7), region = 104 }
 0x1a2   : > { %s1859_s20 = smov %s1855_s14 }
 0x1a3   : > { %s1861_s22 = smov %s1856_s7 }
 0x1a6   :  { %801 = vsyncpa [#allocation3], 1 }
 0x1a7   :  { %803 = vsyncpa [#allocation3 + $0x1], 1 }
 0x1a8   :  { %804 = vsyncpa [#allocation6], 1 }
 0x1a9   :  { %805 = vsyncpa [#allocation4], 1 }
 0x1aa   :  { %807 = vsyncpa [#allocation4 + $0x1], 1 }

</bundles_post_ra>
